<compile_context>
chip_gen: v7x
topology: tpu7x:2x2x1
jax: 0.10.0
libtpu: 0.0.40
codegen_flags: <defaults>
</compile_context>

<pallas_src>
import functools
import math

import jax
import jax.numpy as jnp
import numpy as np
from jax.experimental import pallas as pl
from jax.experimental.pallas import tpu as pltpu


# ---------------------------------------------------------------------------
# Kernels
# ---------------------------------------------------------------------------

def _rope_apply(x_ref, o_ref, cos_t, sin_e, sin_o):
    """Hot loop: x is (1, TL, C) interleaved pairs; tables are (TL, C) f32."""
    x = x_ref[0].astype(jnp.float32)                 # (TL, C) f32 compute
    C = x.shape[-1]
    nxt = pltpu.roll(x, shift=C - 1, axis=1)         # nxt[j] = x[j+1]
    prv = pltpu.roll(x, shift=1, axis=1)             # prv[j] = x[j-1]
    # out[2k]   = x[2k]  *cos - x[2k+1]*sin   (sin_e is -sin at even lanes, 0 at odd)
    # out[2k+1] = x[2k+1]*cos + x[2k]  *sin   (sin_o is +sin at odd lanes, 0 at even)
    # wraparound lanes of the rolls always hit a 0 in the masked tables.
    out = x * cos_t + nxt * sin_e + prv * sin_o
    o_ref[0] = out.astype(o_ref.dtype)


def _rope_kernel_fused(stheta_ref, phase_ref, x_ref, o_ref,
                       cos_scr, sin_even_scr, sin_odd_scr, *, fold):
    """Builds cos/sin tables in VMEM scratch at b == 0, reuses them across B."""
    l = pl.program_id(0)
    b = pl.program_id(1)
    TL, C = cos_scr.shape

    @pl.when(b == 0)
    def _():
        # global token position of (row, lane) = (l*TL + row)*fold + lane//D;
        # the lane//D term and the per-pair sign are folded into phase/stheta
        # (sin(-a) = -sin(a), cos(-a) = cos(a)).
        row = jax.lax.broadcasted_iota(jnp.int32, (TL, C), 0)
        pos = (l * (TL * fold) + row * fold).astype(jnp.float32)
        ang = pos * stheta_ref[...] + phase_ref[...]          # signed angle
        lane = jax.lax.broadcasted_iota(jnp.int32, (TL, C), 1)
        is_even = (lane & 1) == 0
        s = jnp.sin(ang)
        cos_scr[...] = jnp.cos(ang)
        sin_even_scr[...] = jnp.where(is_even, s, 0.0)
        sin_odd_scr[...] = jnp.where(is_even, 0.0, s)

    _rope_apply(x_ref, o_ref, cos_scr[...], sin_even_scr[...], sin_odd_scr[...])


def _rope_kernel_streamed(cos_ref, sin_even_ref, sin_odd_ref, x_ref, o_ref):
    """Fallback: tables precomputed in the wrapper and streamed from HBM."""
    _rope_apply(x_ref, o_ref, cos_ref[...], sin_even_ref[...], sin_odd_ref[...])


@functools.lru_cache(maxsize=None)
def _in_kernel_sincos_ok() -> bool:
    """One-time probe: can this jax/Mosaic build lower jnp.sin/cos in-kernel?"""
    def k(x_ref, o_ref):
        o_ref[...] = jnp.sin(x_ref[...]) + jnp.cos(x_ref[...])
    try:
        x = jnp.zeros((8, 128), jnp.float32)
        f = pl.pallas_call(k, out_shape=jax.ShapeDtypeStruct((8, 128), jnp.float32))
        jax.jit(f).lower(x).compile()
        return True
    except Exception:
        return False


# ---------------------------------------------------------------------------
# Wrapper
# ---------------------------------------------------------------------------

def rope1d(x, theta, *, tl=1024, vmem_budget_bytes=20 * 1024 * 1024):
    """RoPE1D.forward_llama. x: (B, L, D) with D even, theta: (D//2,)."""
    B, L, D = x.shape
    assert D % 2 == 0, f"D={D} must be even"

    # Fold r consecutive positions into the lane axis so the last block dim is
    # a multiple of 128 (unmasked full-width stores).  Contiguous reshape: free.
    if D % 128 == 0:
        r = 1
    else:
        r = 128 // math.gcd(D, 128)
        if L % r != 0:
            r = 1                       # native layout fallback (still correct)
    Lp, C = L // r, r * D
    xf = x.reshape(B, Lp, C)

    # Tiny per-lane theta / phase vectors (2 x (1, C) f32, VMEM-resident for
    # the whole grid).  Sign folded into the angle, fold offset into the phase.
    j = jnp.arange(C, dtype=jnp.int32)
    th = theta.astype(jnp.float32)[(j % D) // 2]                      # (C,)
    sign = jnp.where(j % 2 == 0, jnp.float32(-1.0), jnp.float32(1.0))
    stheta = (sign * th)[None, :]                                     # (1, C)
    phase = ((j // D).astype(jnp.float32) * sign * th)[None, :]       # (1, C)

    # Adaptive L tile: worst-case per-row VMEM (3 f32 tables, double-buffered
    # either as scratch or as streamed inputs, + double-buffered x/out blocks).
    itemsize = jnp.dtype(x.dtype).itemsize
    per_row = C * (6 * 4 + 4 * itemsize)
    cap = max(8, (vmem_budget_bytes // per_row) // 8 * 8)
    TL = min(int(tl), int(cap))
    if TL >= Lp:
        TL = Lp
    else:
        TL = max(8, (TL // 8) * 8)
    # v7x megacore: when B == 1, give the parallel (L) axis at least 2 steps.
    if B == 1 and TL >= Lp and Lp >= 16:
        TL = max(8, (((Lp + 1) // 2 + 7) // 8) * 8)
    nL = pl.cdiv(Lp, TL)

    need = 6 * TL * C * 4 + 4 * TL * C * itemsize + 4 * C * 4
    vmem_limit = int(min(64 * 1024 * 1024, max(32 * 1024 * 1024, 2 * need)))

    if _in_kernel_sincos_ok():
        kernel = functools.partial(_rope_kernel_fused, fold=r)
        in_arrays = (stheta, phase, xf)
        in_specs = [
            pl.BlockSpec((1, C), lambda l, b: (0, 0)),          # signed theta / lane
            pl.BlockSpec((1, C), lambda l, b: (0, 0)),          # phase / lane
            pl.BlockSpec((1, TL, C), lambda l, b: (b, l, 0)),   # x (native dtype)
        ]
        scratch = [pltpu.VMEM((TL, C), jnp.float32)] * 3
        # scratch tables are carried across the batch axis -> it must be
        # sequential ("arbitrary"); L axis stays "parallel" for the megacore.
        semantics = ("parallel", "arbitrary")
    else:
        # Fallback (only if Mosaic can't lower sin/cos): stream pre-masked
        # tables; batch innermost keeps them VMEM-resident across B.
        pos_col = (jnp.arange(Lp, dtype=jnp.float32) * float(r))[:, None]
        ang = pos_col * stheta + phase
        s = jnp.sin(ang)
        lane_even = (j % 2 == 0)[None, :]
        cos_tbl = jnp.cos(ang)
        sin_e = jnp.where(lane_even, s, jnp.float32(0.0))
        sin_o = jnp.where(lane_even, jnp.float32(0.0), s)
        kernel = _rope_kernel_streamed
        in_arrays = (cos_tbl, sin_e, sin_o, xf)
        tbl_spec = pl.BlockSpec((TL, C), lambda l, b: (l, 0))
        in_specs = [tbl_spec, tbl_spec, tbl_spec,
                    pl.BlockSpec((1, TL, C), lambda l, b: (b, l, 0))]
        scratch = []
        semantics = ("parallel", "parallel")

    out = pl.pallas_call(
        kernel,
        out_shape=jax.ShapeDtypeStruct((B, Lp, C), x.dtype),
        grid_spec=pltpu.PrefetchScalarGridSpec(
            num_scalar_prefetch=0,
            grid=(nL, B),                      # batch innermost
            in_specs=in_specs,
            out_specs=pl.BlockSpec((1, TL, C), lambda l, b: (b, l, 0)),
            scratch_shapes=scratch,
        ),
        compiler_params=pltpu.CompilerParams(
            dimension_semantics=semantics,
            vmem_limit_bytes=vmem_limit,
        ),
    )(*in_arrays)
    return out.reshape(B, L, D)


def rope1d_reference(x, theta):
    """Pure-JAX reference mirroring PyTorch forward_llama."""
    B, L, D = x.shape
    Dh = D // 2
    pos = jnp.arange(L, dtype=jnp.float32)
    ang = jnp.outer(pos, theta.astype(jnp.float32))               # (L, Dh)
    c, s = jnp.cos(ang), jnp.sin(ang)
    xr = x.astype(jnp.float32).reshape(B, L, Dh, 2)
    xe, xo = xr[..., 0], xr[..., 1]
    oe = xe * c - xo * s
    oo = xe * s + xo * c
    return jnp.stack([oe, oo], axis=-1).reshape(B, L, D).astype(x.dtype)


if __name__ == "__main__":
    B, L, D = 2, 8, 32
    base = 10000.0

    # deterministic buffer init, matches register_buffer('theta', ...)
    theta = base ** (-jnp.arange(0, D, 2, dtype=jnp.float32)[: D // 2] / D)

    key = jax.random.PRNGKey(0)
    x = jax.random.normal(key, (B, L, D), dtype=jnp.float32)

    out = jax.block_until_ready(rope1d(x, theta))
    ref = rope1d_reference(x, theta)
    assert out.shape == x.shape and out.dtype == x.dtype
    np.testing.assert_allclose(np.asarray(out), np.asarray(ref),
                               rtol=5e-5, atol=5e-5)

    # bf16 input path (native dtype at the HBM boundary, f32 compute in-kernel)
    xb = x.astype(jnp.bfloat16)
    outb = jax.block_until_ready(rope1d(xb, theta))
    refb = rope1d_reference(xb, theta)
    assert outb.dtype == jnp.bfloat16
    np.testing.assert_allclose(np.asarray(outb, dtype=np.float32),
                               np.asarray(refb, dtype=np.float32),
                               rtol=2e-2, atol=2e-2)

    # non-foldable L (exercises the r=1 / full-width-D fallback layout)
    x2 = jax.random.normal(jax.random.PRNGKey(1), (2, 7, 32), dtype=jnp.float32)
    out2 = jax.block_until_ready(rope1d(x2, theta))
    ref2 = rope1d_reference(x2, theta)
    np.testing.assert_allclose(np.asarray(out2), np.asarray(ref2),
                               rtol=5e-5, atol=5e-5)

    print("KERNEL_OK")
</pallas_src>

<mosaic_0001>
module attributes {stable_mosaic.version = 11 : i64} {
  func.func @_rope_kernel_streamed(%arg0: i32, %arg1: i32, %arg2: memref<2x128xf32, #tpu.memory_space<vmem>>, %arg3: memref<2x128xf32, #tpu.memory_space<vmem>>, %arg4: memref<2x128xf32, #tpu.memory_space<vmem>>, %arg5: memref<1x2x128xf32, #tpu.memory_space<vmem>>, %arg6: memref<1x2x128xf32, #tpu.memory_space<vmem>>) attributes {dimension_semantics = [#tpu.dimension_semantics<parallel>, #tpu.dimension_semantics<parallel>], iteration_bounds = array<i64: 1, 2>, scalar_prefetch = 0 : i64, scratch_operands = 0 : i64, tpu.core_type = #tpu.core_type<tc>, window_params = [{transform_indices = @transform_0, window_bounds = array<i64: 2, 128>}, {transform_indices = @transform_1, window_bounds = array<i64: 2, 128>}, {transform_indices = @transform_2, window_bounds = array<i64: 2, 128>}, {transform_indices = @transform_3, window_bounds = array<i64: 1, 2, 128>}, {transform_indices = @transform_4, window_bounds = array<i64: 1, 2, 128>}]} {
    %c0 = arith.constant 0 : index
    %c0_0 = arith.constant 0 : index
    %0 = vector.load %arg2[%c0, %c0_0] : memref<2x128xf32, #tpu.memory_space<vmem>>, vector<2x128xf32>
    %c0_1 = arith.constant 0 : index
    %c0_2 = arith.constant 0 : index
    %1 = vector.load %arg3[%c0_1, %c0_2] : memref<2x128xf32, #tpu.memory_space<vmem>>, vector<2x128xf32>
    %c0_3 = arith.constant 0 : index
    %c0_4 = arith.constant 0 : index
    %2 = vector.load %arg4[%c0_3, %c0_4] : memref<2x128xf32, #tpu.memory_space<vmem>>, vector<2x128xf32>
    %c0_5 = arith.constant 0 : index
    %c0_6 = arith.constant 0 : index
    %c0_7 = arith.constant 0 : index
    %3 = vector.load %arg5[%c0_5, %c0_6, %c0_7] : memref<1x2x128xf32, #tpu.memory_space<vmem>>, vector<1x2x128xf32>
    %4 = vector.shape_cast %3 : vector<1x2x128xf32> to vector<2x128xf32>
    %c127_i32 = arith.constant 127 : i32
    %5 = tpu.dynamic_rotate %4 by %c127_i32 dim 1 : vector<2x128xf32>, i32 -> vector<2x128xf32>
    %c1_i32 = arith.constant 1 : i32
    %6 = tpu.dynamic_rotate %4 by %c1_i32 dim 1 : vector<2x128xf32>, i32 -> vector<2x128xf32>
    %7 = arith.mulf %4, %0 : vector<2x128xf32>
    %8 = arith.mulf %5, %1 : vector<2x128xf32>
    %9 = arith.addf %7, %8 : vector<2x128xf32>
    %10 = arith.mulf %6, %2 : vector<2x128xf32>
    %11 = arith.addf %9, %10 : vector<2x128xf32>
    %c0_8 = arith.constant 0 : index
    %c0_9 = arith.constant 0 : index
    %c0_10 = arith.constant 0 : index
    %12 = vector.load %arg6[%c0_8, %c0_9, %c0_10] : memref<1x2x128xf32, #tpu.memory_space<vmem>>, vector<1x2x128xf32>
    %13 = vector.shape_cast %12 : vector<1x2x128xf32> to vector<2x128xf32>
    %14 = vector.shape_cast %11 : vector<2x128xf32> to vector<1x2x128xf32>
    tpu.vector_store %arg6[%c0_8, %c0_9, %c0_10], %14 {strides = array<i32>} : memref<1x2x128xf32, #tpu.memory_space<vmem>>, vector<1x2x128xf32>,
    return
  }
  func.func @transform_0(%arg0: i32, %arg1: i32) -> (i32, i32) {
    %c0_i32 = arith.constant 0 : i32
    %c0_i32_0 = arith.constant 0 : i32
    return %arg0, %c0_i32 : i32, i32
  }
  func.func @transform_1(%arg0: i32, %arg1: i32) -> (i32, i32) {
    %c0_i32 = arith.constant 0 : i32
    %c0_i32_0 = arith.constant 0 : i32
    return %arg0, %c0_i32 : i32, i32
  }
  func.func @transform_2(%arg0: i32, %arg1: i32) -> (i32, i32) {
    %c0_i32 = arith.constant 0 : i32
    %c0_i32_0 = arith.constant 0 : i32
    return %arg0, %c0_i32 : i32, i32
  }
  func.func @transform_3(%arg0: i32, %arg1: i32) -> (i32, i32, i32) {
    %c0_i32 = arith.constant 0 : i32
    %c0_i32_0 = arith.constant 0 : i32
    return %arg1, %arg0, %c0_i32 : i32, i32, i32
  }
  func.func @transform_4(%arg0: i32, %arg1: i32) -> (i32, i32, i32) {
    %c0_i32 = arith.constant 0 : i32
    %c0_i32_0 = arith.constant 0 : i32
    return %arg1, %arg0, %c0_i32 : i32, i32, i32
  }
}

</mosaic_0001>

<bundles_post_ra>
// kernel: tpu_custom_call.1
= control target key start
LH: loop header
LB: loop body
LE: loop exit
PB: predicated region body
PF: predicated region fallthrough
CT: control target
= control target key end

     0   :  { %9 = vsyncpa [#allocation3], 0  ;;  %s874_s0 = inlined_call_operand.hbm [shape: f32[2,128], index: 0, kind: input, shape index: {}]   ;;  %s875_s1 = inlined_call_operand.vmem [shape: f32[2,128], index: 1, kind: input, shape index: {}]   ;;  %s876_s2 = inlined_call_operand.hbm [shape: f32[2,128], index: 2, kind: input, shape index: {}]   ;;  %s877_s3 = inlined_call_operand.vmem [shape: f32[2,2,128], index: 3, kind: input, shape index: {}]   ;;  %s878_s4 = inlined_call_operand.hbm [shape: f32[2,2,128], index: 4, kind: output, shape index: {}]  }
   0x1   :  { %10 = vsyncpa [#allocation6], 0 }
   0x2   :  { %11 = vsyncpa [#allocation4], 0 }
   0x3   :  { %13 = vsyncpa [#allocation4 + $0x1], 0  ;;  %s684_s15 = smov 0   ;;  %s686_s16 = smov 0  }
   0x4   :  { %s688_s17 = smov 0   ;;  %s690_s18 = smov 0  }
   0x5   :  { %s692_s19 = smov 0   ;;  %s694_s20 = smov 0  }
   0x6 LB: > { %s416_s21 = sadd.s32 4294967295, %s652_s20   ;;  %s417_s22 = sadd.s32 4294967294, %s652_s20   ;;  %s652_s20 = sphi %s694_s20, %s19_s20   ;;  %s648_s19 = sphi %s692_s19, %s896_s19   ;;  %s644_s18 = sphi %s690_s18, %s895_s18   ;;  %s640_s17 = sphi %s688_s17, %s894_s17   ;;  %s636_s16 = sphi %s686_s16, %s893_s16   ;;  %s632_s15 = sphi %s684_s15, %s892_s15  }
   0x7   : > { %s28_s23 = sadd.s32 1, %s648_s19  ;;  %s146_s24 = sadd.s32 1, %s640_s17 }
   0x8   : > { %p29_p0 = scmp.ge.s32.totalorder %s28_s23, 2  ;;  %p156_p1 = scmp.ne.s32.totalorder %s640_s17, %s636_s16 }
   0x9   : > { %p157_p2 = scmp.eq.s32.totalorder %s416_s21, 1  ;;  %p162_p3 = scmp.ne.s32.totalorder %s636_s16, %s632_s15 }
   0xa   : > { %s898_s23 = smov (%p29_p0, %s28_s23), 0  ;;  %p163_p5 = scmp.eq.s32.totalorder %s417_s22, 1 }
   0xb   : > { %p724_p4 = por %p157_p2, %p156_p1  ;;  %s141_s26 = ssub.s32 %s648_s19, %s898_s23 }
   0xc   : > { %p418_p6 = scmp.ge.s32.totalorder %s652_s20, 1  ;;  %p144_p7 = scmp.eq.s32.totalorder %s141_s26, 0 }
   0xd   : > { %s883_s25 = scalar_select %p724_p4, 1, 0 }
   0xe   : > { %p731_p8 = por %p163_p5, %p162_p3  ;;  %p170_p9 = scmp.lt.s32.totalorder %s652_s20, 3 }
   0xf   : > { %s737_s28 = scalar_select %p144_p7, %s640_s17, %s146_s24  }
  0x10   : > { %s884_s27 = scalar_select %p731_p8, 1, 0 }
  0x11   : > { %p739_p10 = pnand %p418_p6, %p170_p9  ;;  %p743_p11 = scmp.eq.s32.totalorder %s416_s21, 0 }
  0x12   : > { %s654_s5 = smov [#allocation2]   ;;  %s655_s7 = smov [#allocation5]  }
  0x13   : > { %s885_s29 = scalar_select %p739_p10, 1, 0 }
  0x14   : > { %s886_s30 = scalar_select %p743_p11, 1, 0 }
  0x15   : > { %p442_p12 = pneg %p739_p10  ;;  %s185_s6 = sshll.u32 %s654_s5, 4  ;;  %s186_s6 = int_to_ptr.vmem [resolvable:$true] %s185_s6 }
  0x16   : > { %s205_s8 = sshll.u32 %s655_s7, 4  ;;  %s510_s12 = scalar_lea.hbm %s874_s0, 32  ;;  %s755_s8 = int_to_ptr.vmem [resolvable:$true] %s205_s8 }
  0x17   : > { %p751_p13 = pnand %p743_p11, %p442_p12  ;;  %p511_p0 = scmp.ne.s32.totalorder %s874_s0, %s510_s12 }
  0x18   : > { %p517_p5 = scmp.lt.u32.totalorder %s510_s12, %s874_s0 }
  0x19   : > { %p512_p1 = pneg %p751_p13 }
  0x1b   : > { %p513_p2 = pnand %p512_p1, %p511_p0 }
  0x1d   : > { %p514_p3 = pneg %p513_p2 }
  0x1f   : > { %p519_p6 = pnand %p517_p5, %p514_p3 }
  0x21   : > { %522 = shalt.err (!%p519_p6)
}
  0x22   : > { %s523_s24 = scalar_lea.vmem %s186_s6, 32  ;;  %p531_p8 = scmp.lt.s32.totalorder %s186_s6, %s186_s6 }
  0x23   : > { %p524_p7 = scmp.ne.s32.totalorder %s186_s6, %s523_s24  ;;  %p532_p4 = scmp.lt.s32.totalorder %s523_s24, %s523_s24 }
  0x25   : > { %p526_p9 = pnand %p524_p7, %p512_p1  ;;  %p533_p11 = por %p532_p4, %p531_p8 }
  0x27   : > { %p527_p12 = pneg %p526_p9 }
  0x29   : > { %p534_p10 = pnand %p533_p11, %p527_p12 }
  0x2b   : > { %537 = shalt.err (!%p534_p10)
}
  0x2c   : > { %445 = dma.hbm_to_vmem [thread:$0]  (!%p751_p13), %s874_s0, 32, %s186_s6, [#allocation3]  }
  0x2d   : > { %s538_s11 = scalar_lea.hbm %s876_s2, 32 }
  0x2e   : > { %p539_p0 = scmp.ne.s32.totalorder %s876_s2, %s538_s11  ;;  %p545_p10 = scmp.lt.u32.totalorder %s538_s11, %s876_s2 }
  0x30   : > { %p541_p4 = pnand %p539_p0, %p512_p1 }
  0x32   : > { %p542_p8 = pneg %p541_p4 }
  0x34   : > { %p547_p11 = pnand %p545_p10, %p542_p8 }
  0x36   : > { %550 = shalt.err (!%p547_p11)
}
  0x37   : > { %s551_s6 = scalar_lea.vmem %s755_s8, 32  ;;  %p559_p6 = scmp.lt.s32.totalorder %s755_s8, %s755_s8 }
  0x38   : > { %p552_p2 = scmp.ne.s32.totalorder %s755_s8, %s551_s6  ;;  %p560_p7 = scmp.lt.s32.totalorder %s551_s6, %s551_s6 }
  0x3a   : > { %p554_p3 = pnand %p552_p2, %p512_p1  ;;  %p561_p9 = por %p560_p7, %p559_p6 }
  0x3c   : > { %p555_p5 = pneg %p554_p3 }
  0x3e   : > { %p562_p12 = pnand %p561_p9, %p555_p5 }
  0x40   : > { %565 = shalt.err (!%p562_p12)
}
  0x41   : > { %448 = dma.hbm_to_vmem [thread:$0]  (!%p751_p13), %s876_s2, 32, %s755_s8, [#allocation6]  }
  0x42   : > { %p888_p0 = scmp.ne.s32.totalorder %s885_s29, 0 }
  0x43   : > { %p889_p4 = scmp.ne.s32.totalorder (!%p888_p0), %s886_s30, 0 }
  0x44   : > { %228 = sbr.rel (%p888_p0) target bundleno = 222 (0xde), region = 36 }
  0x4b   : > { %619 = dma.done.wait (%p889_p4), [#allocation3], 32  }
  0x4c   : > { %621 = vsyncadd (%p889_p4), [#allocation3], 4294967264 }
  0x4d   : > { %623 = dma.done.wait (%p889_p4), [#allocation6], 32  }
  0x4e   : > { %625 = vsyncadd (%p889_p4), [#allocation6], 4294967264  ;;  %p268_p1 = scmp.lt.s32.totalorder %s644_s18, 1  ;;  %s656_s7 = smov 127   ;;  %v275_v1 = vld [vmem:[#allocation2] sm:$0x3] }
  0x4f   : > { %s657_s10 = smov 1   ;;  %s261_s11 = sand.u32 1, %s636_s16   ;;  %v276_v2 = vld [vmem:[%s875_s1] sm:$0x3]  ;;  %v277_v6 = vld [vmem:[#allocation5] sm:$0x3] }
  0x50   : > { %s269_s8 = scalar_select %p268_p1, %s644_s18, 1 }
  0x51   : > { %s426_s13 = sshll.u32 %s261_s11, 1  ;;  %s429_s14 = sshll.u32 %s644_s18, 5 }
  0x52   : > { %s427_s9 = sshll.u32 %s269_s8, 1  ;;  %s263_s21 = scalar_lea.vmem [#allocation7], %s426_s13 }
  0x53   : > { %s274_s5 = scalar_lea.vmem %s877_s3, %s427_s9  ;;  %s304_s6 = sshll.u32 %s263_s21, 4  ;;  %s829_s6 = int_to_ptr.vmem [resolvable:$true] %s304_s6 }
  0x54   : > { %v278_v0 = vld [vmem:[%s274_s5] sm:$0x3]  ;;  %s827_s8 = scalar_lea.hbm %s878_s4, %s429_s14  ;;  %s290_s9 = scalar_lea.sflag [#allocation4], %s261_s11 }
  0x55   : > { %279 = vrot.lane.b32.xlu0 %v278_v0, %s656_s7  ;;  %v283_v4 = vmul.f32 %v278_v0, %v275_v1  ;;  %s566_s29 = scalar_lea.vmem %s829_s6, 32  ;;  %p890_p8 = scmp.ne.s32.totalorder %s883_s25, 0 }
  0x56   : > { %p567_p13 = scmp.ne.s32.totalorder %s829_s6, %s566_s29  ;;  %s658_s18 = smov [#allocation7]  }
  0x57   : > { %s570_s26 = sshll.u32 %s658_s18, 4  ;;  %s571_s26 = int_to_ptr.vmem [resolvable:$false] %s570_s26 }
  0x58   : > { %p568_p10 = pnand %p567_p13, %p890_p8  ;;  %s572_s5 = scalar_lea.vmem %s571_s26, 64 }
  0x59   : > { %281 = vrot.lane.b32.xlu0 %v278_v0, %s657_s10  ;;  %p573_p2 = scmp.lt.s32.totalorder %s829_s6, %s571_s26  ;;  %p574_p3 = scmp.lt.s32.totalorder %s572_s5, %s566_s29 }
  0x5a   : > { %p569_p11 = pneg %p568_p10 }
  0x5b   : > { %p575_p5 = por %p574_p3, %p573_p2 }
  0x5d   : > { %p576_p6 = pnand %p575_p5, %p569_p11 }
  0xc7   : > { %v280_v3 = vpop.permute.xlu0 %279 }
  0xc8   : > { %v284_v5 = vmul.f32 %v280_v3, %v276_v2 }
  0xca   : > { %v285_v8 = vadd.f32 %v284_v5, %v283_v4 }
  0xcb   : > { %v282_v7 = vpop.permute.xlu0 %281 }
  0xcc   : > { %v286_v9 = vmul.f32 %v282_v7, %v277_v6 }
  0xce   : > { %v287_v10 = vadd.f32 %v286_v9, %v285_v8 }
  0xd0   : > { %288 = vst [vmem:[%s263_s21] sm:$0x3] %v287_v10 }
  0xd1   : > { %579 = shalt.err (!%p576_p6)
}
  0xd2   : > { %s580_s7 = scalar_lea.hbm %s827_s8, 32  ;;  %s584_s30 = scalar_lea.hbm %s878_s4, 64 }
  0xd3   : > { %p581_p7 = scmp.ne.s32.totalorder %s827_s8, %s580_s7  ;;  %p585_p0 = scmp.lt.u32.totalorder %s827_s8, %s878_s4 }
  0xd4   : > { %p586_p4 = scmp.lt.u32.totalorder %s584_s30, %s580_s7  ;;  %p588_p13 = scmp.lt.u32.totalorder %s580_s7, %s827_s8 }
  0xd5   : > { %p582_p9 = pnand %p581_p7, %p890_p8 }
  0xd6   : > { %p587_p1 = por %p586_p4, %p585_p0 }
  0xd7   : > { %p583_p12 = pneg %p582_p9 }
  0xd8   : > { %p589_p10 = por %p588_p13, %p587_p1 }
  0xda   : > { %p590_p11 = pnand %p589_p10, %p583_p12 }
  0xdc   : > { %593 = shalt.err (!%p590_p11)
}
  0xdd   : > { %440 = dma.vmem_to_hbm [thread:$0]  (%p890_p8), %s829_s6, 32, %s827_s8, %s290_s9  }
  0xde PF: > { %p457_p2 = scmp.ge.s32.totalorder %s652_s20, 2  ;;  %s316_s14 = sand.u32 1, %s632_s15  }
  0xdf   : > { %p891_p3 = scmp.ne.s32.totalorder %s884_s27, 0  ;;  %s317_s21 = scalar_lea.sflag [#allocation4], %s316_s14 }
  0xe1   : > { %p450_p5 = pnand %p457_p2, %p891_p3 }
  0xe3   : > { %627 = dma.done.wait (!%p450_p5), %s317_s21, 32  }
  0xe4   : > { %629 = vsyncadd (!%p450_p5), %s317_s21, 4294967264  ;;  %s19_s20 = sadd.s32 1, %s652_s20   ;;  %s892_s15 = smov %s636_s16 }
  0xe5   : > { %p16_p6 = scmp.ge.s32.totalorder %s19_s20, 4   ;;  %s893_s16 = smov %s640_s17 }
  0xe6   : > { %s894_s17 = smov %s737_s28  ;;  %s895_s18 = smov %s648_s19 }
  0xe7   : > { %s896_s19 = smov %s898_s23  ;;  %18 = sbr.rel (!%p16_p6) target bundleno = 6 (0x6), region = 85 }
  0xee   :  { %322 = vsyncpa [#allocation3], 1 }
  0xef   :  { %324 = vsyncpa [#allocation3 + $0x1], 1 }
  0xf0   :  { %325 = vsyncpa [#allocation6], 1 }
  0xf1   :  { %326 = vsyncpa [#allocation4], 1 }
  0xf2   :  { %328 = vsyncpa [#allocation4 + $0x1], 1 }

</bundles_post_ra>
